<compile_context>
chip_gen: v6e
topology: v6e:2x2x1
jax: 0.10.0
libtpu: 0.0.40
codegen_flags: <defaults>
</compile_context>

<pallas_src>
import functools

import jax
import jax.numpy as jnp
import numpy as np
from jax.experimental import pallas as pl
from jax.experimental.pallas import tpu as pltpu


def _round_up(x, m):
    return (x + m - 1) // m * m


# -----------------------------------------------------------------------------
# Kernel: in-kernel im2col (static contiguous lane slices of the flattened
# input) + one folded MXU contraction per parity class + bias, bf16 store.
# -----------------------------------------------------------------------------
def _make_subpixel_kernel(class_offsets, L_win_pad):
    n_classes = len(class_offsets)

    def kernel(x_ref, w_ref, b_ref, o_ref):
        # x_ref: (C_in_pad, L_full_pad)     bf16  flattened padded input (1 image)
        # w_ref: (Q, C_out_pad, TTC)        bf16  folded per-class weights (resident)
        # b_ref: (C_out_pad, 1)             f32
        # o_ref: (Q, C_out_pad, L_win_pad)  bf16
        xf = x_ref[...]
        b = b_ref[...]
        for q in range(n_classes):
            # Each tap's shifted window is a contiguous static lane slice.
            cols = [xf[:, off:off + L_win_pad] for off in class_offsets[q]]
            x_col = jnp.concatenate(cols, axis=0)                 # (TTC, L_win_pad)
            acc = jnp.dot(w_ref[q], x_col,
                          preferred_element_type=jnp.float32)     # (C_out_pad, L_win_pad)
            o_ref[q] = (acc + b).astype(o_ref.dtype)

    return kernel


# -----------------------------------------------------------------------------
# Wrapper: ConvTranspose2d forward (NCHW in / NCHW out), groups=1.
# -----------------------------------------------------------------------------
@functools.partial(
    jax.jit,
    static_argnames=("stride", "padding", "output_padding", "dilation"),
)
def conv_transpose2d_pallas(
    x, weight, bias, *, stride=1, padding=0, output_padding=0, dilation=1
):
    # x:      (N, C_in, H, W)          [NCHW, PyTorch convention]
    # weight: (C_in, C_out, kH, kW)    [PyTorch ConvTranspose2d convention]
    # bias:   (C_out,)
    N, C_in, H, W = x.shape
    C_in_w, C_out, K, K2 = weight.shape
    assert C_in_w == C_in and K == K2
    s, p, d, op = stride, padding, dilation, output_padding

    H_out = (H - 1) * s - 2 * p + d * (K - 1) + op + 1
    W_out = (W - 1) * s - 2 * p + d * (K - 1) + op + 1
    assert H_out > 0 and W_out > 0
    H_sub = -(-H_out // s)          # ceil(H_out / s): rows per parity class
    W_sub = -(-W_out // s)

    # ---- static (trace-time) tap/offset tables per output-parity class -----
    # Output row oh = r + j*s (class r).  Tap kh contributes iff
    # (kh*d) % s == (r + p) % s, reading input row ih = j + (r + p - kh*d)//s.
    def tap_table(in_len, out_sub):
        taps, bases = [], []
        for r in range(s):
            tr, br = [], []
            for kk in range(K):
                if (kk * d) % s == (r + p) % s:
                    tr.append(kk)
                    br.append((r + p - kk * d) // s)
            taps.append(tr)
            bases.append(br)
        T = max(1, max(len(t) for t in taps))
        all_b = [b for br in bases for b in br] or [0]
        pad_lo = max(0, -min(all_b))
        pad_hi = max(0, max(all_b) + out_sub - 1 - (in_len - 1))
        # pad tap slots with sentinels (kh = -1 -> zero weight, base = 0)
        taps = [t + [-1] * (T - len(t)) for t in taps]
        bases = [b + [0] * (T - len(b)) for b in bases]
        return taps, bases, T, pad_lo, pad_hi

    taps_h, base_h, T_h, ph_lo, ph_hi = tap_table(H, H_sub)
    taps_w, base_w, T_w, pw_lo, pw_hi = tap_table(W, W_sub)
    TT = T_h * T_w
    Q = s * s
    H_pad = H + ph_lo + ph_hi
    W_pad = W + pw_lo + pw_hi

    # ---- TPU-friendly padded sizes (bf16 operands) --------------------------
    C_in_pad = _round_up(C_in, 8)
    C_out_pad = _round_up(C_out, 16)
    TTC = TT * C_in_pad
    L_win = H_sub * W_pad            # padded-width flattening keeps windows contiguous
    L_win_pad = _round_up(L_win, 128)

    # Static per-(class, tap) lane offsets into the flattened padded input.
    class_offsets = []
    for r_h in range(s):
        for r_w in range(s):
            offs = []
            for t_h in range(T_h):
                bh = base_h[r_h][t_h] + ph_lo
                for t_w in range(T_w):
                    bw = base_w[r_w][t_w] + pw_lo
                    offs.append(bh * W_pad + bw)
            class_offsets.append(tuple(offs))
    class_offsets = tuple(class_offsets)
    max_off = max(max(o) for o in class_offsets)
    L_full_pad = _round_up(max(H_pad * W_pad, max_off + L_win_pad), 128)

    # ---- glue: ONE cheap pass over the input (pad + flatten); no K^2 blow-up -
    x_bf = x.astype(jnp.bfloat16)
    x_p = jnp.pad(
        x_bf, ((0, 0), (0, C_in_pad - C_in), (ph_lo, ph_hi), (pw_lo, pw_hi))
    ).reshape(N, C_in_pad, H_pad * W_pad)
    x_flat = jnp.pad(x_p, ((0, 0), (0, 0), (0, L_full_pad - H_pad * W_pad)))

    # ---- folded per-class weights (tiny) and bias ----------------------------
    w_bf = weight.astype(jnp.bfloat16)
    cls_w = []
    for r_h in range(s):
        for r_w in range(s):
            slots = []
            for t_h in range(T_h):
                kh = taps_h[r_h][t_h]
                for t_w in range(T_w):
                    kw = taps_w[r_w][t_w]
                    if kh < 0 or kw < 0:
                        slots.append(jnp.zeros((C_out, C_in_pad), w_bf.dtype))
                    else:
                        wk = w_bf[:, :, kh, kw].T                 # (C_out, C_in)
                        slots.append(jnp.pad(wk, ((0, 0), (0, C_in_pad - C_in))))
            cls_w.append(jnp.concatenate(slots, axis=1))          # (C_out, TTC)
    w_col = jnp.pad(jnp.stack(cls_w, axis=0),
                    ((0, 0), (0, C_out_pad - C_out), (0, 0)))     # (Q, C_out_pad, TTC)
    b_col = jnp.pad(bias.astype(jnp.float32),
                    (0, C_out_pad - C_out)).reshape(C_out_pad, 1)

    # ---- explicit VMEM budget (double-buffered blocks + temporaries) ---------
    blk_bytes = 2 * (C_in_pad * L_full_pad * 2
                     + Q * C_out_pad * TTC * 2
                     + C_out_pad * 4
                     + Q * C_out_pad * L_win_pad * 2)
    tmp_bytes = 2 * (TTC * L_win_pad * 2 + C_out_pad * L_win_pad * 4)
    vmem_limit = int(min(32 * 1024 * 1024,
                         max(8 * 1024 * 1024, 2 * (blk_bytes + tmp_bytes))))

    kernel = _make_subpixel_kernel(class_offsets, L_win_pad)

    # ---- Pallas call: grid over batch only; weights stay VMEM-resident -------
    out_col = pl.pallas_call(
        kernel,
        out_shape=jax.ShapeDtypeStruct((N, Q, C_out_pad, L_win_pad), jnp.bfloat16),
        grid_spec=pltpu.PrefetchScalarGridSpec(
            num_scalar_prefetch=0,
            grid=(N,),
            in_specs=[
                # one image's flattened padded input per grid step
                pl.BlockSpec((None, C_in_pad, L_full_pad), lambda n: (n, 0, 0)),
                # all Q folded weight slabs, constant index -> fetched once
                pl.BlockSpec((Q, C_out_pad, TTC), lambda n: (0, 0, 0)),
                pl.BlockSpec((C_out_pad, 1), lambda n: (0, 0)),
            ],
            out_specs=pl.BlockSpec((None, Q, C_out_pad, L_win_pad),
                                   lambda n: (n, 0, 0, 0)),
        ),
        compiler_params=pltpu.CompilerParams(
            dimension_semantics=("parallel",),
            vmem_limit_bytes=vmem_limit,
        ),
    )(x_flat, w_col, b_col)

    # ---- epilogue: drop padding, interleave parity sub-grids back to NCHW ----
    out_sub = out_col[:, :, :C_out, :L_win].reshape(
        N, s, s, C_out, H_sub, W_pad)[..., :W_sub]
    out = jnp.transpose(out_sub, (0, 3, 4, 1, 5, 2)).reshape(
        N, C_out, H_sub * s, W_sub * s)[:, :, :H_out, :W_out]
    return out.astype(x.dtype)


def cond_conv_transpose2d_forward(inputs, weight, bias, **conv_kwargs):
    """Mirrors CondConvTranspose2d.forward: ((img, label)) -> (out, label)."""
    img, label = inputs
    out = conv_transpose2d_pallas(img, weight, bias, **conv_kwargs)
    return out, label


# -----------------------------------------------------------------------------
# Independent NumPy reference (scatter formulation of ConvTranspose2d).
# -----------------------------------------------------------------------------
def ref_conv_transpose2d(x, w, b, stride, padding, output_padding, dilation):
    x, w, b = np.asarray(x), np.asarray(w), np.asarray(b)
    N, C_in, H, W = x.shape
    _, C_out, K, _ = w.shape
    H_out = (H - 1) * stride - 2 * padding + dilation * (K - 1) + output_padding + 1
    W_out = (W - 1) * stride - 2 * padding + dilation * (K - 1) + output_padding + 1
    full_H = (H - 1) * stride + dilation * (K - 1) + 1 + output_padding
    full_W = (W - 1) * stride + dilation * (K - 1) + 1 + output_padding
    out_full = np.zeros((N, C_out, full_H, full_W), np.float32)
    for ih in range(H):
        for iw in range(W):
            contrib = np.einsum("nc,cokl->nokl", x[:, :, ih, iw], w)
            out_full[
                :,
                :,
                ih * stride : ih * stride + dilation * (K - 1) + 1 : dilation,
                iw * stride : iw * stride + dilation * (K - 1) + 1 : dilation,
            ] += contrib
    out = out_full[:, :, padding : padding + H_out, padding : padding + W_out]
    return out + b[None, :, None, None]


if __name__ == "__main__":
    # Module config (typical GAN upsample block): 4 -> 8 channels, k=4, s=2, p=1
    in_channels, out_channels = 4, 8
    kernel_size, stride, padding, output_padding, dilation = 4, 2, 1, 0, 1

    key = jax.random.PRNGKey(0)
    k_w, k_b, k_x, k_l = jax.random.split(key, 4)

    # Deterministic synthetic parameters (PyTorch ConvTranspose2d shapes).
    weight = 0.02 * jax.random.normal(
        k_w, (in_channels, out_channels, kernel_size, kernel_size), jnp.float32
    )
    bias = 0.01 * jax.random.normal(k_b, (out_channels,), jnp.float32)

    # Inputs: (img, label) tuple, img is NCHW.
    img = jax.random.normal(k_x, (2, in_channels, 16, 16), jnp.float32)
    label = jax.random.randint(k_l, (2,), 0, 10, jnp.int32)

    out, label_out = cond_conv_transpose2d_forward(
        (img, label),
        weight,
        bias,
        stride=stride,
        padding=padding,
        output_padding=output_padding,
        dilation=dilation,
    )
    out = jax.block_until_ready(out)

    # Check against a NumPy reference with bf16-quantized activations/weights
    # (kernel feeds bf16 to the MXU, accumulates in f32, stores the result in
    # bf16, so tolerances are at the bf16 level).
    img_q = np.asarray(img.astype(jnp.bfloat16).astype(jnp.float32))
    w_q = np.asarray(weight.astype(jnp.bfloat16).astype(jnp.float32))
    ref = ref_conv_transpose2d(
        img_q, w_q, bias, stride, padding, output_padding, dilation
    )
    assert out.shape == ref.shape, (out.shape, ref.shape)
    np.testing.assert_allclose(np.asarray(out), ref, rtol=2e-2, atol=2e-3)
    assert bool(jnp.all(label_out == label))

    print("KERNEL_OK")
</pallas_src>

<mosaic_0001>
module attributes {stable_mosaic.version = 11 : i64} {
  func.func @kernel(%arg0: i32, %arg1: memref<1x8x512xbf16, #tpu.memory_space<vmem>>, %arg2: memref<4x16x32xbf16, #tpu.memory_space<vmem>>, %arg3: memref<16x1xf32, #tpu.memory_space<vmem>>, %arg4: memref<1x4x16x384xbf16, #tpu.memory_space<vmem>>) attributes {dimension_semantics = [#tpu.dimension_semantics<parallel>], iteration_bounds = array<i64: 2>, scalar_prefetch = 0 : i64, scratch_operands = 0 : i64, tpu.core_type = #tpu.core_type<tc>, window_params = [{transform_indices = @transform_0, window_bounds = array<i64: 1, 8, 512>}, {pipeline_mode = #tpu.pipeline_mode<synchronous>, transform_indices = @transform_1, window_bounds = array<i64: 4, 16, 32>}, {pipeline_mode = #tpu.pipeline_mode<synchronous>, transform_indices = @transform_2, window_bounds = array<i64: 16, 1>}, {transform_indices = @transform_3, window_bounds = array<i64: 1, 4, 16, 384>}]} {
    %c0 = arith.constant 0 : index
    %c0_0 = arith.constant 0 : index
    %c0_1 = arith.constant 0 : index
    %0 = vector.load %arg1[%c0, %c0_0, %c0_1] : memref<1x8x512xbf16, #tpu.memory_space<vmem>>, vector<1x8x512xbf16>
    %1 = vector.shape_cast %0 : vector<1x8x512xbf16> to vector<8x512xbf16>
    %c0_2 = arith.constant 0 : index
    %c0_3 = arith.constant 0 : index
    %2 = vector.load %arg3[%c0_2, %c0_3] : memref<16x1xf32, #tpu.memory_space<vmem>>, vector<16x1xf32>
    %3 = vector.extract_strided_slice %1 {offsets = [0, 19], sizes = [8, 384], strides = [1, 1]} : vector<8x512xbf16> to vector<8x384xbf16>
    %4 = vector.extract_strided_slice %1 {offsets = [0, 18], sizes = [8, 384], strides = [1, 1]} : vector<8x512xbf16> to vector<8x384xbf16>
    %5 = vector.extract_strided_slice %1 {offsets = [0, 1], sizes = [8, 384], strides = [1, 1]} : vector<8x512xbf16> to vector<8x384xbf16>
    %6 = vector.extract_strided_slice %1 {offsets = [0, 0], sizes = [8, 384], strides = [1, 1]} : vector<8x512xbf16> to vector<8x384xbf16>
    %7 = tpu.concatenate %3, %4, %5, %6 in 0 : vector<8x384xbf16>, vector<8x384xbf16>, vector<8x384xbf16>, vector<8x384xbf16> -> vector<32x384xbf16>
    %c0_4 = arith.constant 0 : index
    %c0_5 = arith.constant 0 : index
    %c0_6 = arith.constant 0 : index
    %8 = vector.load %arg2[%c0_4, %c0_5, %c0_6] : memref<4x16x32xbf16, #tpu.memory_space<vmem>>, vector<1x16x32xbf16>
    %9 = vector.shape_cast %8 : vector<1x16x32xbf16> to vector<16x32xbf16>
    %cst = arith.constant dense<0.000000e+00> : vector<16x384xf32>
    %10 = tpu.matmul %9, %7, %cst {dimension_numbers = #tpu.dot_dimension_numbers<[1], [0], [0], [1], [0, 0, 1, 1], [], []>} : vector<16x32xbf16>, vector<32x384xbf16>, vector<16x384xf32> -> vector<16x384xf32>
    %11 = vector.broadcast %2 : vector<16x1xf32> to vector<16x384xf32>
    %12 = arith.addf %10, %11 : vector<16x384xf32>
    %13 = arith.truncf %12 : vector<16x384xf32> to vector<16x384xbf16>
    %c0_7 = arith.constant 0 : index
    %c0_8 = arith.constant 0 : index
    %c0_9 = arith.constant 0 : index
    %c0_10 = arith.constant 0 : index
    %14 = vector.load %arg4[%c0_7, %c0_8, %c0_9, %c0_10] : memref<1x4x16x384xbf16, #tpu.memory_space<vmem>>, vector<1x1x16x384xbf16>
    %15 = vector.shape_cast %14 : vector<1x1x16x384xbf16> to vector<16x384xbf16>
    %16 = vector.shape_cast %13 : vector<16x384xbf16> to vector<1x1x16x384xbf16>
    tpu.vector_store %arg4[%c0_7, %c0_8, %c0_9, %c0_10], %16 {strides = array<i32>} : memref<1x4x16x384xbf16, #tpu.memory_space<vmem>>, vector<1x1x16x384xbf16>,
    %17 = vector.extract_strided_slice %1 {offsets = [0, 20], sizes = [8, 384], strides = [1, 1]} : vector<8x512xbf16> to vector<8x384xbf16>
    %18 = vector.extract_strided_slice %1 {offsets = [0, 19], sizes = [8, 384], strides = [1, 1]} : vector<8x512xbf16> to vector<8x384xbf16>
    %19 = vector.extract_strided_slice %1 {offsets = [0, 2], sizes = [8, 384], strides = [1, 1]} : vector<8x512xbf16> to vector<8x384xbf16>
    %20 = vector.extract_strided_slice %1 {offsets = [0, 1], sizes = [8, 384], strides = [1, 1]} : vector<8x512xbf16> to vector<8x384xbf16>
    %21 = tpu.concatenate %17, %18, %19, %20 in 0 : vector<8x384xbf16>, vector<8x384xbf16>, vector<8x384xbf16>, vector<8x384xbf16> -> vector<32x384xbf16>
    %c1 = arith.constant 1 : index
    %c0_11 = arith.constant 0 : index
    %c0_12 = arith.constant 0 : index
    %22 = vector.load %arg2[%c1, %c0_11, %c0_12] : memref<4x16x32xbf16, #tpu.memory_space<vmem>>, vector<1x16x32xbf16>
    %23 = vector.shape_cast %22 : vector<1x16x32xbf16> to vector<16x32xbf16>
    %cst_13 = arith.constant dense<0.000000e+00> : vector<16x384xf32>
    %24 = tpu.matmul %23, %21, %cst_13 {dimension_numbers = #tpu.dot_dimension_numbers<[1], [0], [0], [1], [0, 0, 1, 1], [], []>} : vector<16x32xbf16>, vector<32x384xbf16>, vector<16x384xf32> -> vector<16x384xf32>
    %25 = vector.broadcast %2 : vector<16x1xf32> to vector<16x384xf32>
    %26 = arith.addf %24, %25 : vector<16x384xf32>
    %27 = arith.truncf %26 : vector<16x384xf32> to vector<16x384xbf16>
    %c0_14 = arith.constant 0 : index
    %c1_15 = arith.constant 1 : index
    %c0_16 = arith.constant 0 : index
    %c0_17 = arith.constant 0 : index
    %28 = vector.load %arg4[%c0_14, %c1_15, %c0_16, %c0_17] : memref<1x4x16x384xbf16, #tpu.memory_space<vmem>>, vector<1x1x16x384xbf16>
    %29 = vector.shape_cast %28 : vector<1x1x16x384xbf16> to vector<16x384xbf16>
    %30 = vector.shape_cast %27 : vector<16x384xbf16> to vector<1x1x16x384xbf16>
    tpu.vector_store %arg4[%c0_14, %c1_15, %c0_16, %c0_17], %30 {strides = array<i32>} : memref<1x4x16x384xbf16, #tpu.memory_space<vmem>>, vector<1x1x16x384xbf16>,
    %31 = vector.extract_strided_slice %1 {offsets = [0, 37], sizes = [8, 384], strides = [1, 1]} : vector<8x512xbf16> to vector<8x384xbf16>
    %32 = vector.extract_strided_slice %1 {offsets = [0, 36], sizes = [8, 384], strides = [1, 1]} : vector<8x512xbf16> to vector<8x384xbf16>
    %33 = vector.extract_strided_slice %1 {offsets = [0, 19], sizes = [8, 384], strides = [1, 1]} : vector<8x512xbf16> to vector<8x384xbf16>
    %34 = vector.extract_strided_slice %1 {offsets = [0, 18], sizes = [8, 384], strides = [1, 1]} : vector<8x512xbf16> to vector<8x384xbf16>
    %35 = tpu.concatenate %31, %32, %33, %34 in 0 : vector<8x384xbf16>, vector<8x384xbf16>, vector<8x384xbf16>, vector<8x384xbf16> -> vector<32x384xbf16>
    %c2 = arith.constant 2 : index
    %c0_18 = arith.constant 0 : index
    %c0_19 = arith.constant 0 : index
    %36 = vector.load %arg2[%c2, %c0_18, %c0_19] : memref<4x16x32xbf16, #tpu.memory_space<vmem>>, vector<1x16x32xbf16>
    %37 = vector.shape_cast %36 : vector<1x16x32xbf16> to vector<16x32xbf16>
    %cst_20 = arith.constant dense<0.000000e+00> : vector<16x384xf32>
    %38 = tpu.matmul %37, %35, %cst_20 {dimension_numbers = #tpu.dot_dimension_numbers<[1], [0], [0], [1], [0, 0, 1, 1], [], []>} : vector<16x32xbf16>, vector<32x384xbf16>, vector<16x384xf32> -> vector<16x384xf32>
    %39 = vector.broadcast %2 : vector<16x1xf32> to vector<16x384xf32>
    %40 = arith.addf %38, %39 : vector<16x384xf32>
    %41 = arith.truncf %40 : vector<16x384xf32> to vector<16x384xbf16>
    %c0_21 = arith.constant 0 : index
    %c2_22 = arith.constant 2 : index
    %c0_23 = arith.constant 0 : index
    %c0_24 = arith.constant 0 : index
    %42 = vector.load %arg4[%c0_21, %c2_22, %c0_23, %c0_24] : memref<1x4x16x384xbf16, #tpu.memory_space<vmem>>, vector<1x1x16x384xbf16>
    %43 = vector.shape_cast %42 : vector<1x1x16x384xbf16> to vector<16x384xbf16>
    %44 = vector.shape_cast %41 : vector<16x384xbf16> to vector<1x1x16x384xbf16>
    tpu.vector_store %arg4[%c0_21, %c2_22, %c0_23, %c0_24], %44 {strides = array<i32>} : memref<1x4x16x384xbf16, #tpu.memory_space<vmem>>, vector<1x1x16x384xbf16>,
    %45 = vector.extract_strided_slice %1 {offsets = [0, 38], sizes = [8, 384], strides = [1, 1]} : vector<8x512xbf16> to vector<8x384xbf16>
    %46 = vector.extract_strided_slice %1 {offsets = [0, 37], sizes = [8, 384], strides = [1, 1]} : vector<8x512xbf16> to vector<8x384xbf16>
    %47 = vector.extract_strided_slice %1 {offsets = [0, 20], sizes = [8, 384], strides = [1, 1]} : vector<8x512xbf16> to vector<8x384xbf16>
    %48 = vector.extract_strided_slice %1 {offsets = [0, 19], sizes = [8, 384], strides = [1, 1]} : vector<8x512xbf16> to vector<8x384xbf16>
    %49 = tpu.concatenate %45, %46, %47, %48 in 0 : vector<8x384xbf16>, vector<8x384xbf16>, vector<8x384xbf16>, vector<8x384xbf16> -> vector<32x384xbf16>
    %c3 = arith.constant 3 : index
    %c0_25 = arith.constant 0 : index
    %c0_26 = arith.constant 0 : index
    %50 = vector.load %arg2[%c3, %c0_25, %c0_26] : memref<4x16x32xbf16, #tpu.memory_space<vmem>>, vector<1x16x32xbf16>
    %51 = vector.shape_cast %50 : vector<1x16x32xbf16> to vector<16x32xbf16>
    %cst_27 = arith.constant dense<0.000000e+00> : vector<16x384xf32>
    %52 = tpu.matmul %51, %49, %cst_27 {dimension_numbers = #tpu.dot_dimension_numbers<[1], [0], [0], [1], [0, 0, 1, 1], [], []>} : vector<16x32xbf16>, vector<32x384xbf16>, vector<16x384xf32> -> vector<16x384xf32>
    %53 = vector.broadcast %2 : vector<16x1xf32> to vector<16x384xf32>
    %54 = arith.addf %52, %53 : vector<16x384xf32>
    %55 = arith.truncf %54 : vector<16x384xf32> to vector<16x384xbf16>
    %c0_28 = arith.constant 0 : index
    %c3_29 = arith.constant 3 : index
    %c0_30 = arith.constant 0 : index
    %c0_31 = arith.constant 0 : index
    %56 = vector.load %arg4[%c0_28, %c3_29, %c0_30, %c0_31] : memref<1x4x16x384xbf16, #tpu.memory_space<vmem>>, vector<1x1x16x384xbf16>
    %57 = vector.shape_cast %56 : vector<1x1x16x384xbf16> to vector<16x384xbf16>
    %58 = vector.shape_cast %55 : vector<16x384xbf16> to vector<1x1x16x384xbf16>
    tpu.vector_store %arg4[%c0_28, %c3_29, %c0_30, %c0_31], %58 {strides = array<i32>} : memref<1x4x16x384xbf16, #tpu.memory_space<vmem>>, vector<1x1x16x384xbf16>,
    return
  }
  func.func @transform_0(%arg0: i32) -> (i32, i32, i32) {
    %c0_i32 = arith.constant 0 : i32
    %c0_i32_0 = arith.constant 0 : i32
    %c0_i32_1 = arith.constant 0 : i32
    return %arg0, %c0_i32, %c0_i32_0 : i32, i32, i32
  }
  func.func @transform_1(%arg0: i32) -> (i32, i32, i32) {
    %c0_i32 = arith.constant 0 : i32
    %c0_i32_0 = arith.constant 0 : i32
    %c0_i32_1 = arith.constant 0 : i32
    %c0_i32_2 = arith.constant 0 : i32
    return %c0_i32, %c0_i32_0, %c0_i32_1 : i32, i32, i32
  }
  func.func @transform_2(%arg0: i32) -> (i32, i32) {
    %c0_i32 = arith.constant 0 : i32
    %c0_i32_0 = arith.constant 0 : i32
    %c0_i32_1 = arith.constant 0 : i32
    return %c0_i32, %c0_i32_0 : i32, i32
  }
  func.func @transform_3(%arg0: i32) -> (i32, i32, i32, i32) {
    %c0_i32 = arith.constant 0 : i32
    %c0_i32_0 = arith.constant 0 : i32
    %c0_i32_1 = arith.constant 0 : i32
    %c0_i32_2 = arith.constant 0 : i32
    return %arg0, %c0_i32, %c0_i32_0, %c0_i32_1 : i32, i32, i32, i32
  }
}

</mosaic_0001>

<bundles_post_ra>
// kernel: conv_transpose2d_pallas.1
= control target key start
LH: loop header
LB: loop body
LE: loop exit
PB: predicated region body
PF: predicated region fallthrough
CT: control target
= control target key end

     0   :  { %s1106_s12 = smov 0   ;;  %s1285_s0 = inlined_call_operand.vmem [shape: bf16[2,8,512], index: 0, kind: input, shape index: {}]   ;;  %s1286_s1 = inlined_call_operand.vmem [shape: bf16[4,16,32], index: 1, kind: input, shape index: {}]   ;;  %s1287_s2 = inlined_call_operand.vmem [shape: f32[16,1], index: 2, kind: input, shape index: {}]   ;;  %s1288_s3 = inlined_call_operand.vmem [shape: bf16[2,4,16,384], index: 3, kind: output, shape index: {}]  }
   0x1 LB: > { %s918_s13 = sadd.s32 4294967295, %s1074_s12   ;;  %p922_p0 = scmp.ge.s32.totalorder %s1074_s12, 1  ;;  %s1074_s12 = sphi %s1106_s12, %s13_s12  }
   0x2   : > { %p137_p1 = scmp.lt.s32.totalorder %s1074_s12, 3 }
   0x4   : > { %p138_p2 = pnand %p922_p0, %p137_p1 }
   0x5   : > { %p161_p3 = scmp.lt.s32.totalorder (!%p138_p2), %s918_s13, 1  ;;  %s1076_s18 = smov (!%p138_p2), 18  }
   0x6   : > { %141 = sbr.rel (%p138_p2) target bundleno = 524 (0x20c), region = 32  ;;  %s1077_s19 = smov (!%p138_p2), 19  }
   0x7   : > { %s1078_s20 = smov (!%p138_p2), 1   ;;  %s1080_s21 = smov (!%p138_p2), 109  }
   0x8   : > { %s1081_s22 = smov (!%p138_p2), 108   ;;  %s1083_s23 = smov (!%p138_p2), 91  }
   0x9   : > { %s1085_s24 = smov (!%p138_p2), 90  }
   0xb   : > { %s1290_s13 = smov (!%p161_p3, %s918_s13), 1  ;;  %vm219_vm0 = vcmask 1043456   ;;  %v1079_v8 = vmov 0.0   ;;  %vm206_vm1 = vcmask 146432   ;;  %vm216_vm2 = vcmask 154624   ;;  %v174_v38 = vld [vmem:[%s1287_s2] sm:$0xff] }
   0xc   : > { %s978_s14 = sshll.u32 %s1290_s13, 4  ;;  %1007 = vmatprep.subr.bf16.mxu1 %v1079_v8  ;;  %vm194_vm3 = vcmask 7168   ;;  %vm1082_vm4 = vmmov 0   ;;  %v1084_v32 = vmov 0   ;;  %v175_v39 = vld [vmem:[%s1287_s2 + $0x8] sm:$0xff]  ;;  %vm285_vm5 = vcmask 891904  }
   0xd   : > { %s165_s17 = scalar_lea.vmem %s1285_s0, %s978_s14  ;;  %1011 = vmatprep.mubr.msk.bf16.mxu1 %vm1082_vm4, %v1079_v8  ;;  %334 = vmatprep.mubr.bf16.mxu0 %v1084_v32  ;;  %v1064_v50 = vld [vmem:[%s1286_s1] sm:$0xff]   ;;  %vm298_vm6 = vcmask 261120   ;;  %vm440_vm7 = vcmask 883712   ;;  %v1065_v63 = vld [vmem:[%s1286_s1 + $0x8] sm:$0xff]   ;;  %vm589_vm8 = vcmask 744448   ;;  %vm738_vm9 = vcmask 736256  }
   0xe   : > { %v173_v0 = vld [vmem:[%s165_s17 + $0x8] sm:$0xff]  ;;  %v172_v1 = vld [vmem:[%s165_s17] sm:$0xff]  ;;  %1059 = vset.pattern.permute.xlu1 %v1084_v32  ;;  %1058 = vset.pattern.permute.xlu0 %v1084_v32  ;;  %s1039_s10 = smul.u32 96, %s1290_s13 }
   0xf   : > { %v928_v2 = vcombine.low %v173_v0, %v173_v0  ;;  %v926_v3 = vcombine.low %v172_v1, %v172_v1  ;;  %v1120_v4 = vcombine.high %v172_v1, %v172_v1  ;;  %v929_v5 = vcombine.high %v173_v0, %v173_v0 }
  0x10   : > { %s1241_s15 = scalar_lea.vmem %s1288_s3, %s1039_s10 }
  0x11   : > { %202 = vrot.lane.b32.xlu1 %v928_v2, %s1076_s18  ;;  %198 = vrot.lane.b32.xlu0 %v926_v3, %s1076_s18 }
  0x15   : > { %210 = vrot.lane.b32.xlu1 %v926_v3, %s1077_s19  ;;  %200 = vrot.lane.b32.xlu0 %v1120_v4, %s1076_s18 }
  0x19   : > { %214 = vrot.lane.b32.xlu1 %v928_v2, %s1077_s19  ;;  %212 = vrot.lane.b32.xlu0 %v1120_v4, %s1077_s19 }
  0x1d   : > { %186 = vrot.lane.b32.xlu1 %v926_v3, %s1078_s20  ;;  %204 = vrot.lane.b32.xlu0 %v929_v5, %s1076_s18 }
  0x21   : > { %190 = vrot.lane.b32.xlu1 %v928_v2, %s1078_s20  ;;  %188 = vrot.lane.b32.xlu0 %v1120_v4, %s1078_s20 }
  0x25   : > { %410 = vrot.lane.b32.xlu1 %v929_v5, %s1077_s19  ;;  %192 = vrot.lane.b32.xlu0 %v929_v5, %s1078_s20 }
  0x83   : > { %v203_v6 = vpop.permute.xlu1 %202  ;;  %v199_v7 = vpop.permute.xlu0 %198 }
  0x87   : > { %v211_v9 = vpop.permute.xlu1 %210  ;;  %v201_v10 = vpop.permute.xlu0 %200 }
  0x88   : > { %v234_v11 = vsel %vm219_vm0, %v199_v7, %v211_v9  ;;  %v208_v14 = vsel %vm206_vm1, %v201_v10, %v203_v6  ;;  %v207_v34 = vsel %vm206_vm1, %v199_v7, %v201_v10 }
  0x89   : > { %277 = vrot.lane.b32.xlu0 %v234_v11, %s1080_s21 }
  0x8b   : > { %v215_v12 = vpop.permute.xlu1 %214  ;;  %v213_v13 = vpop.permute.xlu0 %212 }
  0x8c   : > { %v218_v15 = vsel %vm216_vm2, %v213_v13, %v215_v12  ;;  %v217_v33 = vsel %vm216_vm2, %v211_v9, %v213_v13 }
  0x8d   : > { %v240_v16 = vsel %vm219_vm0, %v208_v14, %v218_v15  ;;  %v237_v35 = vsel %vm219_vm0, %v207_v34, %v217_v33 }
  0x8e   : > { %281 = vrot.lane.b32.xlu1 %v240_v16, %s1080_s21 }
  0x8f   : > { %v187_v17 = vpop.permute.xlu1 %186  ;;  %v205_v18 = vpop.permute.xlu0 %204 }
  0x90   : > { %v222_v19 = vsel %vm219_vm0, %v926_v3, %v187_v17  ;;  %v209_v20 = vsel %vm206_vm1, %v203_v6, %v205_v18 }
  0x91   : > { %269 = vrot.lane.b32.xlu0 %v222_v19, %s1080_s21  ;;  %v243_v21 = vsel %vm219_vm0, %v209_v20, %v215_v12 }
  0x92   : > { %283 = vrot.lane.b32.xlu1 %v243_v21, %s1080_s21 }
  0x93   : > { %v191_v22 = vpop.permute.xlu1 %190  ;;  %v189_v23 = vpop.permute.xlu0 %188 }
  0x94   : > { %v196_v24 = vsel %vm194_vm3, %v189_v23, %v191_v22  ;;  %v195_v36 = vsel %vm194_vm3, %v187_v17, %v189_v23 }
  0x95   : > { %432 = vrot.lane.b32.xlu0 %v234_v11, %s1081_s22  ;;  %v228_v25 = vsel %vm219_vm0, %v928_v2, %v196_v24  ;;  %v225_v37 = vsel %vm219_vm0, %v1120_v4, %v195_v36  ;;  %v1067_v36 = vld [vmem:[%s1286_s1 + $0x18] sm:$0xff]  }
  0x96   : > { %273 = vrot.lane.b32.xlu1 %v228_v25, %s1080_s21 }
  0x97   : > { %v193_v26 = vpop.permute.xlu0 %192  ;;  %v411_v29 = vpop.permute.xlu1 %410 }
  0x98   : > { %v197_v27 = vsel %vm194_vm3, %v191_v22, %v193_v26  ;;  %v412_v30 = vsel %vm216_vm2, %v215_v12, %v411_v29 }
  0x99   : > { %424 = vrot.lane.b32.xlu0 %v222_v19, %s1081_s22  ;;  %v231_v28 = vsel %vm219_vm0, %v929_v5, %v197_v27  ;;  %v414_v31 = vsel %vm219_vm0, %v209_v20, %v412_v30 }
  0x9a   : > { %275 = vrot.lane.b32.xlu1 %v231_v28, %s1080_s21 }
  0x9d   : > { %581 = vrot.lane.b32.xlu0 %v234_v11, %s1083_s23 }
  0x9e   : > { %436 = vrot.lane.b32.xlu1 %v240_v16, %s1081_s22 }
  0xa1   : > { %573 = vrot.lane.b32.xlu0 %v222_v19, %s1083_s23 }
  0xa2   : > { %438 = vrot.lane.b32.xlu1 %v414_v31, %s1081_s22 }
  0xa5   : > { %730 = vrot.lane.b32.xlu0 %v234_v11, %s1085_s24 }
  0xa6   : > { %428 = vrot.lane.b32.xlu1 %v228_v25, %s1081_s22 }
  0xa9   : > { %279 = vrot.lane.b32.xlu0 %v237_v35, %s1080_s21 }
  0xaa   : > { %430 = vrot.lane.b32.xlu1 %v231_v28, %s1081_s22 }
  0xad   : > { %271 = vrot.lane.b32.xlu0 %v225_v37, %s1080_s21 }
  0xae   : > { %585 = vrot.lane.b32.xlu1 %v240_v16, %s1083_s23 }
  0xb1   : > { %434 = vrot.lane.b32.xlu0 %v237_v35, %s1081_s22 }
  0xb2   : > { %587 = vrot.lane.b32.xlu1 %v414_v31, %s1083_s23 }
  0xb5   : > { %426 = vrot.lane.b32.xlu0 %v225_v37, %s1081_s22 }
  0xb6   : > { %577 = vrot.lane.b32.xlu1 %v228_v25, %s1083_s23 }
  0xb9   : > { %583 = vrot.lane.b32.xlu0 %v237_v35, %s1083_s23 }
  0xba   : > { %579 = vrot.lane.b32.xlu1 %v231_v28, %s1083_s23 }
  0xbd   : > { %575 = vrot.lane.b32.xlu0 %v225_v37, %s1083_s23 }
  0xbe   : > { %734 = vrot.lane.b32.xlu1 %v240_v16, %s1085_s24 }
  0xc1   : > { %732 = vrot.lane.b32.xlu0 %v237_v35, %s1085_s24 }
  0xc2   : > { %736 = vrot.lane.b32.xlu1 %v414_v31, %s1085_s24 }
  0xc5   : > { %724 = vrot.lane.b32.xlu0 %v225_v37, %s1085_s24 }
  0xc6   : > { %726 = vrot.lane.b32.xlu1 %v228_v25, %s1085_s24 }
  0xc9   : > { %722 = vrot.lane.b32.xlu0 %v222_v19, %s1085_s24  ;;  %v1066_v19 = vld [vmem:[%s1286_s1 + $0x10] sm:$0xff]  }
  0xca   : > { %728 = vrot.lane.b32.xlu1 %v231_v28, %s1085_s24 }
  0xcd   : > { %248 = vperm.xlu0 %1058, %v174_v38  }
  0xce   : > { %253 = vperm.xlu1 %1059, %v175_v39  }
  0xfb   : > { %v278_v40 = vpop.permute.xlu0 %277 }
 0x100   : > { %v282_v41 = vpop.permute.xlu1 %281 }
 0x103   : > { %v270_v42 = vpop.permute.xlu0 %269 }
 0x104   : > { %v284_v43 = vpop.permute.xlu1 %283 }
 0x105   : > { %v291_v44 = vsel %vm285_vm5, %v282_v41, %v284_v43 }
 0x106   : > { %1008 = vmatpush3.bf16.msra.mxu1 %v291_v44 }
 0x107   : > { %v433_v45 = vpop.permute.xlu0 %432  ;;  %1009 = vmatprep.subr.bf16.mxu1 %v1079_v8 }
 0x108   : > { %v274_v46 = vpop.permute.xlu1 %273 }
 0x10b   : > { %v425_v47 = vpop.permute.xlu0 %424 }
 0x10c   : > { %v276_v48 = vpop.permute.xlu1 %275 }
 0x10d   : > { %v288_v49 = vsel %vm285_vm5, %v274_v46, %v276_v48 }
 0x10e   : > { %1010 = vmatpush3.bf16.msra.mxu1 %v288_v49 }
 0x10f   : > { %v582_v51 = vpop.permute.xlu0 %581  ;;  %1015 = vmatprep.subr.bf16.mxu1 %v1079_v8 }
 0x110   : > { %v437_v52 = vpop.permute.xlu1 %436 }
 0x111   : > { %1012 = vmatmul.mubr.msk.bf16.vlgmr.msra.gmra.mxu1 %vm298_vm6, %v1064_v50 }
 0x112   : > { %1019 = vmatprep.mubr.msk.bf16.mxu1 %vm1082_vm4, %v1079_v8 }
 0x113   : > { %v574_v53 = vpop.permute.xlu0 %573 }
 0x114   : > { %v439_v54 = vpop.permute.xlu1 %438 }
 0x115   : > { %v446_v55 = vsel %vm440_vm7, %v437_v52, %v439_v54 }
 0x116   : > { %1016 = vmatpush3.bf16.msra.mxu1 %v446_v55 }
 0x117   : > { %v731_v56 = vpop.permute.xlu0 %730  ;;  %1017 = vmatprep.subr.bf16.mxu1 %v1079_v8 }
 0x118   : > { %v429_v57 = vpop.permute.xlu1 %428 }
 0x11b   : > { %v280_v58 = vpop.permute.xlu0 %279 }
 0x11c   : > { %v431_v59 = vpop.permute.xlu1 %430  ;;  %v290_v60 = vsel %vm285_vm5, %v280_v58, %v282_v41  ;;  %v289_v61 = vsel %vm285_vm5, %v278_v40, %v280_v58 }
 0x11d   : > { %v443_v62 = vsel %vm440_vm7, %v429_v57, %v431_v59  ;;  %314 = vmatprep.subr.bf16.mxu0 %v290_v60 }
 0x11e   : > { %315 = vmatpush1.bf16.msra.mxu0 %v289_v61  ;;  %1018 = vmatpush3.bf16.msra.mxu1 %v443_v62 }
 0x11f   : > { %v272_v0 = vpop.permute.xlu0 %271  ;;  %1023 = vmatprep.subr.bf16.mxu1 %v1079_v8 }
 0x120   : > { %v586_v1 = vpop.permute.xlu1 %585  ;;  %v287_v2 = vsel %vm285_vm5, %v272_v0, %v274_v46  ;;  %v286_v3 = vsel %vm285_vm5, %v270_v42, %v272_v0 }
 0x121   : > { %316 = vmatprep.subr.bf16.mxu0 %v287_v2  ;;  %1020 = vmatmul.mubr.msk.bf16.vlgmr.msra.gmra.mxu1 %vm298_vm6, %v1065_v63 }
 0x122   : > { %317 = vmatpush1.bf16.msra.mxu0 %v286_v3  ;;  %1027 = vmatprep.mubr.msk.bf16.mxu1 %vm1082_vm4, %v1079_v8 }
 0x123   : > { %v435_v4 = vpop.permute.xlu0 %434 }
 0x124   : > { %v444_v5 = vsel %vm440_vm7, %v433_v45, %v435_v4  ;;  %v588_v6 = vpop.permute.xlu1 %587  ;;  %v445_v7 = vsel %vm440_vm7, %v435_v4, %v437_v52 }
 0x125   : > { %v595_v9 = vsel %vm589_vm8, %v586_v1, %v588_v6  ;;  %931 = vmatmul.mubr.msk.bf16.vlgmr.msra.gmra.mxu0 %vm298_vm6, %v1064_v50  ;;  %468 = vmatprep.subr.bf16.mxu0 %v445_v7 }
 0x126   : > { %469 = vmatpush1.bf16.msra.mxu0 %v444_v5  ;;  %1024 = vmatpush3.bf16.msra.mxu1 %v595_v9 }
 0x127   : > { %v427_v10 = vpop.permute.xlu0 %426  ;;  %488 = vmatprep.mubr.bf16.mxu0 %v1084_v32  ;;  %1025 = vmatprep.subr.bf16.mxu1 %v1079_v8 }
 0x128   : > { %v441_v11 = vsel %vm440_vm7, %v425_v47, %v427_v10  ;;  %v578_v12 = vpop.permute.xlu1 %577  ;;  %v442_v13 = vsel %vm440_vm7, %v427_v10, %v429_v57 }
 0x129   : > { %470 = vmatprep.subr.bf16.mxu0 %v442_v13 }
 0x12a   : > { %471 = vmatpush1.bf16.msra.mxu0 %v441_v11 }
 0x12b   : > { %v584_v14 = vpop.permute.xlu0 %583 }
 0x12c   : > { %v593_v15 = vsel %vm589_vm8, %v582_v51, %v584_v14  ;;  %v580_v16 = vpop.permute.xlu1 %579  ;;  %v594_v17 = vsel %vm589_vm8, %v584_v14, %v586_v1 }
 0x12d   : > { %v592_v18 = vsel %vm589_vm8, %v578_v12, %v580_v16  ;;  %940 = vmatmul.mubr.msk.bf16.vlgmr.msra.gmra.mxu0 %vm298_vm6, %v1065_v63  ;;  %617 = vmatprep.subr.bf16.mxu0 %v594_v17 }
 0x12e   : > { %618 = vmatpush1.bf16.msra.mxu0 %v593_v15  ;;  %1026 = vmatpush3.bf16.msra.mxu1 %v592_v18 }
 0x12f   : > { %v576_v20 = vpop.permute.xlu0 %575  ;;  %637 = vmatprep.mubr.bf16.mxu0 %v1084_v32  ;;  %1031 = vmatprep.subr.bf16.mxu1 %v1079_v8 }
 0x130   : > { %v590_v21 = vsel %vm589_vm8, %v574_v53, %v576_v20  ;;  %v735_v22 = vpop.permute.xlu1 %734  ;;  %v591_v23 = vsel %vm589_vm8, %v576_v20, %v578_v12 }
 0x131   : > { %619 = vmatprep.subr.bf16.mxu0 %v591_v23  ;;  %1028 = vmatmul.mubr.msk.bf16.vlgmr.msra.gmra.mxu1 %vm298_vm6, %v1066_v19 }
 0x132   : > { %620 = vmatpush1.bf16.msra.mxu0 %v590_v21  ;;  %1035 = vmatprep.mubr.msk.bf16.mxu1 %vm1082_vm4, %v1079_v8 }
 0x133   : > { %v733_v24 = vpop.permute.xlu0 %732 }
 0x134   : > { %v742_v25 = vsel %vm738_vm9, %v731_v56, %v733_v24  ;;  %v737_v26 = vpop.permute.xlu1 %736  ;;  %v743_v27 = vsel %vm738_vm9, %v733_v24, %v735_v22 }
 0x135   : > { %v744_v28 = vsel %vm738_vm9, %v735_v22, %v737_v26  ;;  %953 = vmatmul.mubr.msk.bf16.vlgmr.msra.gmra.mxu0 %vm298_vm6, %v1066_v19  ;;  %766 = vmatprep.subr.bf16.mxu0 %v743_v27 }
 0x136   : > { %767 = vmatpush1.bf16.msra.mxu0 %v742_v25  ;;  %1032 = vmatpush3.bf16.msra.mxu1 %v744_v28 }
 0x137   : > { %v725_v29 = vpop.permute.xlu0 %724  ;;  %1033 = vmatprep.subr.bf16.mxu1 %v1079_v8  ;;  %786 = vmatprep.mubr.bf16.mxu0 %v1084_v32 }
 0x138   : > { %v727_v30 = vpop.permute.xlu1 %726 }
 0x139   : > { %v740_v31 = vsel %vm738_vm9, %v725_v29, %v727_v30 }
 0x13a   : > { %768 = vmatprep.subr.bf16.mxu0 %v740_v31 }
 0x13b   : > { %v723_v33 = vpop.permute.xlu0 %722 }
 0x13c   : > { %v739_v34 = vsel %vm738_vm9, %v723_v33, %v725_v29  ;;  %v729_v35 = vpop.permute.xlu1 %728 }
 0x13d   : > { %v741_v37 = vsel %vm738_vm9, %v727_v30, %v729_v35  ;;  %769 = vmatpush1.bf16.msra.mxu0 %v739_v34 }
 0x13e   : > { %1034 = vmatpush3.bf16.msra.mxu1 %v741_v37 }
 0x140   : > { %966 = vmatmul.mubr.msk.bf16.vlgmr.msra.gmra.mxu0 %vm298_vm6, %v1067_v36 }
 0x141   : > { %1036 = vmatmul.mubr.msk.bf16.vlgmr.msra.gmra.mxu1 %vm298_vm6, %v1067_v36 }
 0x148   : > { %v1233_v32 = vpop.permute.xlu0 %248 }
 0x149   : > { %v1236_v40 = vpop.permute.xlu1 %253 }
 0x1d1   : > { %v379_v8 = vpop.f32.mrf.mxu1 }
 0x1d2   : > { %v380_v38 = vadd.f32 %v379_v8, %v1233_v32 }
 0x1d3   : > { %v1013_v39 = vpop.f32.mrf.mxu1 }
 0x1d4   : > { %v980_v41 = vpack.c.bf16 %v380_v38, %v380_v38 }
 0x1d5   : > { %v382_v42 = vpop.f32.mrf.mxu1 }
 0x1d6   : > { %v383_v43 = vadd.f32 %v382_v42, %v1236_v40  ;;  %407 = vst [vmem:[%s1241_s15 + $0x8] sm:$0xf] %v980_v41 }
 0x1d7   : > { %v1014_v44 = vpop.f32.mrf.mxu1 }
 0x1d8   : > { %v982_v45 = vpack.c.bf16 %v383_v43, %v383_v43 }
 0x1da   : > { %409 = vst [vmem:[%s1241_s15 + $0x14] sm:$0xf] %v982_v45 }
 0x1e1   : > { %v533_v46 = vpop.f32.mrf.mxu1 }
 0x1e2   : > { %v534_v47 = vadd.f32 %v533_v46, %v1233_v32 }
 0x1e3   : > { %v1021_v48 = vpop.f32.mrf.mxu1 }
 0x1e4   : > { %v984_v49 = vpack.c.bf16 %v534_v47, %v534_v47 }
 0x1e5   : > { %v336_v50 = vpop.f32.mrf.mxu0  ;;  %v536_v51 = vpop.f32.mrf.mxu1 }
 0x1e6   : > { %v337_v52 = vadd.f32 %v336_v50, %v1233_v32  ;;  %947 = vst [vmem:[%s1241_s15 + $0x20] sm:$0xf] %v984_v49  ;;  %v537_v53 = vadd.f32 %v536_v51, %v1236_v40 }
 0x1e7   : > { %v338_v54 = vpop.f32.mrf.mxu0  ;;  %v1022_v55 = vpop.f32.mrf.mxu1 }
 0x1e8   : > { %v339_v56 = vadd.f32 %v338_v54, %v1233_v32  ;;  %v986_v57 = vpack.c.bf16 %v537_v53, %v537_v53 }
 0x1e9   : > { %v340_v58 = vpop.f32.mrf.mxu0 }
 0x1ea   : > { %v979_v59 = vpack.c.bf16 %v339_v56, %v337_v52  ;;  %949 = vst [vmem:[%s1241_s15 + $0x2c] sm:$0xf] %v986_v57  ;;  %v341_v61 = vadd.f32 %v340_v58, %v1236_v40 }
 0x1eb   : > { %v342_v60 = vpop.f32.mrf.mxu0 }
 0x1ec   : > { %406 = vst [vmem:[%s1241_s15] sm:$0xff] %v979_v59  ;;  %v343_v62 = vadd.f32 %v342_v60, %v1236_v40 }
 0x1ed   : > { %v490_v63 = vpop.f32.mrf.mxu0 }
 0x1ee   : > { %v981_v0 = vpack.c.bf16 %v343_v62, %v341_v61  ;;  %v491_v1 = vadd.f32 %v490_v63, %v1233_v32 }
 0x1ef   : > { %v492_v2 = vpop.f32.mrf.mxu0 }
 0x1f0   : > { %408 = vst [vmem:[%s1241_s15 + $0xc] sm:$0xff] %v981_v0  ;;  %v493_v3 = vadd.f32 %v492_v2, %v1233_v32 }
 0x1f1   : > { %v494_v4 = vpop.f32.mrf.mxu0  ;;  %v682_v5 = vpop.f32.mrf.mxu1 }
 0x1f2   : > { %v983_v6 = vpack.c.bf16 %v493_v3, %v491_v1  ;;  %v683_v7 = vadd.f32 %v682_v5, %v1233_v32  ;;  %v495_v11 = vadd.f32 %v494_v4, %v1236_v40 }
 0x1f3   : > { %v496_v9 = vpop.f32.mrf.mxu0  ;;  %v1029_v10 = vpop.f32.mrf.mxu1 }
 0x1f4   : > { %946 = vst [vmem:[%s1241_s15 + $0x18] sm:$0xff] %v983_v6  ;;  %v497_v12 = vadd.f32 %v496_v9, %v1236_v40  ;;  %v988_v13 = vpack.c.bf16 %v683_v7, %v683_v7 }
 0x1f5   : > { %v639_v14 = vpop.f32.mrf.mxu0  ;;  %v685_v15 = vpop.f32.mrf.mxu1 }
 0x1f6   : > { %v985_v16 = vpack.c.bf16 %v497_v12, %v495_v11  ;;  %v640_v17 = vadd.f32 %v639_v14, %v1233_v32  ;;  %960 = vst [vmem:[%s1241_s15 + $0x38] sm:$0xf] %v988_v13  ;;  %v686_v18 = vadd.f32 %v685_v15, %v1236_v40 }
 0x1f7   : > { %v641_v19 = vpop.f32.mrf.mxu0  ;;  %v1030_v20 = vpop.f32.mrf.mxu1 }
 0x1f8   : > { %948 = vst [vmem:[%s1241_s15 + $0x24] sm:$0xff] %v985_v16  ;;  %v642_v21 = vadd.f32 %v641_v19, %v1233_v32  ;;  %v990_v22 = vpack.c.bf16 %v686_v18, %v686_v18 }
 0x1f9   : > { %v643_v23 = vpop.f32.mrf.mxu0 }
 0x1fa   : > { %v987_v24 = vpack.c.bf16 %v642_v21, %v640_v17  ;;  %962 = vst [vmem:[%s1241_s15 + $0x44] sm:$0xf] %v990_v22  ;;  %v644_v26 = vadd.f32 %v643_v23, %v1236_v40 }
 0x1fb   : > { %v645_v25 = vpop.f32.mrf.mxu0 }
 0x1fc   : > { %959 = vst [vmem:[%s1241_s15 + $0x30] sm:$0xff] %v987_v24  ;;  %v646_v27 = vadd.f32 %v645_v25, %v1236_v40 }
 0x1fe   : > { %v989_v28 = vpack.c.bf16 %v646_v27, %v644_v26 }
 0x200   : > { %961 = vst [vmem:[%s1241_s15 + $0x3c] sm:$0xff] %v989_v28  ;;  %v788_v29 = vpop.f32.mrf.mxu0 }
 0x201   : > { %v831_v30 = vpop.f32.mrf.mxu1  ;;  %v789_v34 = vadd.f32 %v788_v29, %v1233_v32 }
 0x202   : > { %v832_v31 = vadd.f32 %v831_v30, %v1233_v32  ;;  %v790_v33 = vpop.f32.mrf.mxu0 }
 0x203   : > { %v791_v35 = vadd.f32 %v790_v33, %v1233_v32  ;;  %v1037_v36 = vpop.f32.mrf.mxu1 }
 0x204   : > { %v992_v37 = vpack.c.bf16 %v832_v31, %v832_v31  ;;  %v792_v8 = vpop.f32.mrf.mxu0 }
 0x205   : > { %v991_v38 = vpack.c.bf16 %v791_v35, %v789_v34  ;;  %v834_v39 = vpop.f32.mrf.mxu1  ;;  %v793_v43 = vadd.f32 %v792_v8, %v1236_v40 }
 0x206   : > { %973 = vst [vmem:[%s1241_s15 + $0x50] sm:$0xf] %v992_v37  ;;  %v835_v41 = vadd.f32 %v834_v39, %v1236_v40  ;;  %v794_v42 = vpop.f32.mrf.mxu0 }
 0x207   : > { %972 = vst [vmem:[%s1241_s15 + $0x48] sm:$0xff] %v991_v38  ;;  %v795_v44 = vadd.f32 %v794_v42, %v1236_v40  ;;  %v1038_v45 = vpop.f32.mrf.mxu1 }
 0x208   : > { %v994_v46 = vpack.c.bf16 %v835_v41, %v835_v41 }
 0x209   : > { %v993_v47 = vpack.c.bf16 %v795_v44, %v793_v43 }
 0x20a   : > { %975 = vst [vmem:[%s1241_s15 + $0x5c] sm:$0xf] %v994_v46 }
 0x20b   : > { %974 = vst [vmem:[%s1241_s15 + $0x54] sm:$0xff] %v993_v47 }
 0x20c PF: > { %s13_s12 = sadd.s32 1, %s1074_s12  }
 0x20d   : > { %p10_p4 = scmp.ge.s32.totalorder %s13_s12, 4  }
 0x20f   :  { %12 = sbr.rel (!%p10_p4) target bundleno = 1 (0x1), region = 68 }

</bundles_post_ra>
